<compile_context>
chip_gen: v5e
topology: v5e:2x2
jax: 0.10.0
libtpu: 0.0.40
codegen_flags: <defaults>
</compile_context>

<pallas_src>
import jax
import jax.numpy as jnp
from jax import lax
from jax.experimental import pallas as pl
from jax.experimental.pallas import tpu as pltpu

_LANES = 128
_SUB = 8
_SUB_ROWS = 512                   # rows per in-kernel sub-chunk (~256 KiB f32 temps)
_BLOCK_BYTES = 8 * 1024 * 1024    # ~8 MiB of input per grid step
_N_SPLIT = 2                      # leading "parallel" axis -> both TCs on v7x (harmless on 1-TC)


def _make_entropy_sum_kernel(eps, rows, block_rows, sub_rows, per_core, needs_mask):
    eps = float(eps)              # Python scalar -> literal in the kernel jaxpr (no captured consts)
    n_sub = block_rows // sub_rows

    def kernel(x_ref, o_ref):
        c = pl.program_id(0)      # TensorCore split ("parallel")
        i = pl.program_id(1)      # reduction step   ("arbitrary")

        # o_ref maps to the same (8,128) block for every i -> resident accumulator.
        @pl.when(i == 0)
        def _():
            o_ref[...] = jnp.zeros_like(o_ref)

        # Logical (unclamped) block id; may exceed the real block count for the
        # duplicated / ragged trailing blocks -> fully neutralized by the row mask.
        block = c * per_core + i
        row0 = block * block_rows

        def chunk_sum(start, masked):
            xs = x_ref[pl.ds(start, sub_rows), :].astype(jnp.float32)
            if masked:
                rid = (
                    lax.broadcasted_iota(jnp.int32, (sub_rows, _LANES), 0)
                    + row0 + start
                )
                xs = jnp.where(rid < rows, xs, 0.0)   # 0 * log(0 + eps) == 0, no NaNs
            v = xs * jnp.log(xs + eps)                # EUP log + VPU mul
            # (sub_rows,128) -> (sub_rows//8, 8, 128): sublane-aligned VPU adds only.
            return v.reshape(sub_rows // _SUB, _SUB, _LANES).sum(axis=0)

        def block_sum(masked):
            if n_sub == 1:
                return chunk_sum(0, masked)

            def body(j, acc):
                start = pl.multiple_of(j * sub_rows, sub_rows)
                return acc + chunk_sum(start, masked)

            return lax.fori_loop(0, n_sub, body,
                                 jnp.zeros((_SUB, _LANES), jnp.float32))

        if needs_mask:
            # Only ragged / overflow blocks pay the mask; full blocks are mask-free.
            is_full = row0 + block_rows <= rows

            @pl.when(is_full)
            def _():
                o_ref[...] += block_sum(False)

            @pl.when(jnp.logical_not(is_full))
            def _():
                o_ref[...] += block_sum(True)
        else:
            o_ref[...] += block_sum(False)

    return kernel


def _entropy_sum_jax(v, eps):
    v = v.astype(jnp.float32)
    return jnp.sum(v * jnp.log(v + jnp.float32(eps)))


def entropy_loss(x, eps=1e-12):
    """Pallas implementation of EntropyLoss.forward for NCHW input x (any float dtype)."""
    B, C, H, W = x.shape
    n_positions = B * H * W                # denominator of the mean over (B, H, W)
    total = B * C * H * W

    flat = x.reshape(-1)                   # free: contiguous collapse, native dtype
    itemsize = jnp.dtype(x.dtype).itemsize
    mult = max(_SUB, 32 // itemsize)       # native sublane multiple: 8 f32 / 16 bf16 / 32 int8

    bulk = (total // _LANES) * _LANES
    rows = bulk // _LANES

    total_sum = jnp.float32(0.0)

    if rows >= mult:
        flat_bulk = flat if bulk == total else flat[:bulk]
        x2d = flat_bulk.reshape(rows, _LANES)        # lane-dense view, native dtype

        # --- block / sub-chunk sizing -----------------------------------------
        default_block_rows = _BLOCK_BYTES // (_LANES * itemsize)   # multiple of 512
        if rows >= default_block_rows:
            block_rows, sub_rows = default_block_rows, _SUB_ROWS
        elif rows >= 2 * _SUB_ROWS:
            block_rows = (rows // _SUB_ROWS) * _SUB_ROWS
            sub_rows = _SUB_ROWS
        else:
            block_rows = (rows // mult) * mult
            sub_rows = block_rows

        num_blocks = int(pl.cdiv(rows, block_rows))
        n_split = _N_SPLIT if num_blocks >= _N_SPLIT else 1
        per_core = int(pl.cdiv(num_blocks, n_split))
        needs_mask = (n_split * per_core * block_rows) != rows

        kernel = _make_entropy_sum_kernel(
            eps, rows, block_rows, sub_rows, per_core, needs_mask)

        block_bytes = block_rows * _LANES * itemsize
        vmem_limit = min(48 * 1024 * 1024, 2 * block_bytes + 16 * 1024 * 1024)

        partials = pl.pallas_call(
            kernel,
            out_shape=jax.ShapeDtypeStruct((n_split, _SUB, _LANES), jnp.float32),
            grid_spec=pltpu.PrefetchScalarGridSpec(
                num_scalar_prefetch=0,
                grid=(n_split, per_core),
                in_specs=[
                    pl.BlockSpec(
                        (block_rows, _LANES),
                        # Clamp the block index so the DMA stays in bounds; overflow
                        # blocks re-read the last block and are masked to zero in-kernel.
                        lambda c, i: (jnp.minimum(c * per_core + i, num_blocks - 1), 0),
                    )
                ],
                out_specs=pl.BlockSpec((None, _SUB, _LANES), lambda c, i: (c, 0, 0)),
            ),
            compiler_params=pltpu.CompilerParams(
                dimension_semantics=("parallel", "arbitrary"),
                vmem_limit_bytes=int(vmem_limit),
            ),
            cost_estimate=pl.CostEstimate(
                flops=3 * bulk,
                transcendentals=bulk,
                bytes_accessed=bulk * itemsize + n_split * _SUB * _LANES * 4,
            ),
        )(x2d)

        total_sum = total_sum + jnp.sum(partials)

        if bulk < total:
            # Tiny tail (< 128 elements): plain JAX.
            total_sum = total_sum + _entropy_sum_jax(flat[bulk:], eps)
    else:
        # Input too small for a Pallas tile: plain JAX.
        total_sum = total_sum + _entropy_sum_jax(flat, eps)

    return (-total_sum / n_positions).astype(jnp.float32)


def entropy_loss_ref(x, eps=1e-12):
    """Pure-JAX reference mirroring the PyTorch module."""
    xf = x.astype(jnp.float32)
    b = xf * jnp.log(xf + eps)
    b = -1.0 * b.sum(axis=1)
    return b.mean()


if __name__ == "__main__":
    key = jax.random.PRNGKey(0)
    # Small NCHW input; softmax over channels so x looks like probabilities
    # (the typical use of EntropyLoss), though the kernel works for any x >= 0.
    logits = jax.random.normal(key, (2, 4, 16, 16), dtype=jnp.float32)
    x = jax.nn.softmax(logits, axis=1)

    out = jax.block_until_ready(entropy_loss(x))
    ref = entropy_loss_ref(x)
    assert jnp.allclose(out, ref, atol=1e-5, rtol=1e-5), (out, ref)
    print("KERNEL_OK")
</pallas_src>

<mosaic_0001>
module attributes {stable_mosaic.version = 11 : i64} {
  func.func @kernel(%arg0: i32, %arg1: i32, %arg2: memref<16x128xf32, #tpu.memory_space<vmem>>, %arg3: memref<1x8x128xf32, #tpu.memory_space<vmem>>) attributes {dimension_semantics = [#tpu.dimension_semantics<parallel>, #tpu.dimension_semantics<arbitrary>], iteration_bounds = array<i64: 1, 1>, scalar_prefetch = 0 : i64, scratch_operands = 0 : i64, tpu.core_type = #tpu.core_type<tc>, window_params = [{transform_indices = @transform_0, window_bounds = array<i64: 16, 128>}, {transform_indices = @transform_1, window_bounds = array<i64: 1, 8, 128>}]} {
    %c0_i32 = arith.constant 0 : i32
    %0 = arith.cmpi eq, %arg1, %c0_i32 : i32
    %1 = arith.extui %0 : i1 to i32
    %c0_i32_0 = arith.constant 0 : i32
    %2 = arith.cmpi ne, %1, %c0_i32_0 : i32
    scf.if %2 {
      %cst_9 = arith.constant 0.000000e+00 : f32
      %16 = vector.broadcast %cst_9 : f32 to vector<8x128xf32>
      %c0_10 = arith.constant 0 : index
      %c0_11 = arith.constant 0 : index
      %c0_12 = arith.constant 0 : index
      %17 = vector.load %arg3[%c0_10, %c0_11, %c0_12] : memref<1x8x128xf32, #tpu.memory_space<vmem>>, vector<1x8x128xf32>
      %18 = vector.shape_cast %17 : vector<1x8x128xf32> to vector<8x128xf32>
      %19 = vector.shape_cast %16 : vector<8x128xf32> to vector<1x8x128xf32>
      tpu.vector_store %arg3[%c0_10, %c0_11, %c0_12], %19 {strides = array<i32>} : memref<1x8x128xf32, #tpu.memory_space<vmem>>, vector<1x8x128xf32>,
    } else {
    }
    %c0 = arith.constant 0 : index
    %c0_1 = arith.constant 0 : index
    %c0_2 = arith.constant 0 : index
    %3 = vector.load %arg3[%c0, %c0_1, %c0_2] : memref<1x8x128xf32, #tpu.memory_space<vmem>>, vector<1x8x128xf32>
    %4 = vector.shape_cast %3 : vector<1x8x128xf32> to vector<8x128xf32>
    %c0_3 = arith.constant 0 : index
    %c0_4 = arith.constant 0 : index
    %5 = vector.load %arg2[%c0_3, %c0_4] : memref<16x128xf32, #tpu.memory_space<vmem>>, vector<16x128xf32>
    %cst = arith.constant 9.99999996E-13 : f32
    %6 = vector.broadcast %cst : f32 to vector<16x128xf32>
    %7 = arith.addf %5, %6 : vector<16x128xf32>
    %8 = math.log %7 : vector<16x128xf32>
    %9 = arith.mulf %5, %8 : vector<16x128xf32>
    %10 = vector.shape_cast %9 : vector<16x128xf32> to vector<2x8x128xf32>
    %cst_5 = arith.constant dense<0.000000e+00> : vector<8x128xf32>
    %11 = vector.multi_reduction <add>, %10, %cst_5 [0] : vector<2x8x128xf32> to vector<8x128xf32>
    %12 = arith.addf %4, %11 : vector<8x128xf32>
    %c0_6 = arith.constant 0 : index
    %c0_7 = arith.constant 0 : index
    %c0_8 = arith.constant 0 : index
    %13 = vector.load %arg3[%c0_6, %c0_7, %c0_8] : memref<1x8x128xf32, #tpu.memory_space<vmem>>, vector<1x8x128xf32>
    %14 = vector.shape_cast %13 : vector<1x8x128xf32> to vector<8x128xf32>
    %15 = vector.shape_cast %12 : vector<8x128xf32> to vector<1x8x128xf32>
    tpu.vector_store %arg3[%c0_6, %c0_7, %c0_8], %15 {strides = array<i32>} : memref<1x8x128xf32, #tpu.memory_space<vmem>>, vector<1x8x128xf32>,
    return
  }
  func.func @transform_0(%arg0: i32, %arg1: i32) -> (i32, i32) {
    %c1_i32 = arith.constant 1 : i32
    %0 = arith.muli %arg0, %c1_i32 : i32
    %1 = arith.addi %0, %arg1 : i32
    %c0_i32 = arith.constant 0 : i32
    %2 = arith.minsi %1, %c0_i32 : i32
    %c0_i32_0 = arith.constant 0 : i32
    %c0_i32_1 = arith.constant 0 : i32
    return %2, %c0_i32_0 : i32, i32
  }
  func.func @transform_1(%arg0: i32, %arg1: i32) -> (i32, i32, i32) {
    %c0_i32 = arith.constant 0 : i32
    %c0_i32_0 = arith.constant 0 : i32
    %c0_i32_1 = arith.constant 0 : i32
    return %arg0, %c0_i32, %c0_i32_0 : i32, i32, i32
  }
}

</mosaic_0001>

<bundles_post_ra>
// kernel: tpu_custom_call.1
= control target key start
LH: loop header
LB: loop body
LE: loop exit
PB: predicated region body
PF: predicated region fallthrough
CT: control target
= control target key end

     0   :  { %6 = vsyncpa [#allocation3], 0  ;;  %s154_s0 = inlined_call_operand.hbm [shape: f32[16,128], index: 0, kind: input, shape index: {}]   ;;  %s155_s1 = inlined_call_operand.hbm [shape: f32[1,8,128], index: 1, kind: output, shape index: {}]  }
   0x1   :  { %7 = vsyncpa [#allocation4], 0  ;;  %s18_s8 = sshll.u32 %s154_s0, 4  ;;  %s134_s9 = smov [#allocation2]   ;;  %s19_s8 = int_to_ptr.hbm [resolvable:$true] %s18_s8 }
   0x2   :  { %s20_s10 = sshll.u32 %s134_s9, 4  ;;  %s135_s11 = smov 128   ;;  %s21_s10 = int_to_ptr.vmem [resolvable:$true] %s20_s10 }
   0x3   :  { %s136_s12 = smov 8  }
   0x4   :  { %26 = dma.hbm_to_vmem [thread:$0]  %s19_s8, 256, %s21_s10, [#allocation3], %s135_s11, %s135_s11, %s136_s12  }
   0x5   :  { %130 = dma.done.wait [#allocation3], 256  }
   0x6   :  { %131 = vsyncadd [#allocation3], 4294967040  ;;  %v41_v0 = vld [vmem:[#allocation2] sm:$0xff]  ;;  %v42_v1 = vld [vmem:[#allocation2 + $0x8] sm:$0xff]  ;;  %s137_s0 = smov [#allocation5]   ;;  %s61_s16 = sshll.u32 %s155_s1, 4  ;;  %s62_s16 = int_to_ptr.hbm [resolvable:$true] %s61_s16 }
   0x7   :  { %v43_v2 = vadd.f32 1e-12, %v41_v0  ;;  %v44_v3 = vadd.f32 1e-12, %v42_v1  ;;  %s59_s13 = sshll.u32 %s137_s0, 4  ;;  %s60_s13 = int_to_ptr.vmem [resolvable:$true] %s59_s13 }
   0x9   :  { %78 = vlog2.f32 %v43_v2 }
   0xa   :  { %80 = vlog2.f32 %v44_v3 }
   0xf   :  { %v79_v4 = vpop.eup %78 }
  0x10   :  { %v81_v5 = vpop.eup %80  ;;  %v46_v6 = vmul.f32 0.6931472, %v79_v4 }
  0x11   :  { %v48_v7 = vmul.f32 0.6931472, %v81_v5 }
  0x12   :  { %v49_v8 = vmul.f32 %v46_v6, %v41_v0 }
  0x13   :  { %v50_v9 = vmul.f32 %v48_v7, %v42_v1 }
  0x15   :  { %v51_v10 = vadd.f32 %v50_v9, %v49_v8 }
  0x17   :  { %53 = vst [vmem:[#allocation5] sm:$0xff] %v51_v10 }
  0x18   :  { %64 = dma.vmem_to_hbm [thread:$0]  %s60_s13, 128, %s62_s16, [#allocation4]  }
  0x19   :  { %132 = dma.done.wait [#allocation4], 128  }
  0x1a   :  { %133 = vsyncadd [#allocation4], 4294967168 }
  0x1b   :  { %69 = vsyncpa [#allocation3], 1 }
  0x1c   :  { %70 = vsyncpa [#allocation4], 1 }

</bundles_post_ra>
